<compile_context>
chip_gen: v5e
topology: v5e:2x2
jax: 0.10.0
libtpu: 0.0.40
codegen_flags: <defaults>
</compile_context>

<pallas_src>
import jax
import jax.numpy as jnp
import numpy as np
from jax import lax
from jax.experimental import pallas as pl
from jax.experimental.pallas import tpu as pltpu


def _mcw_kernel(c1_ref, c2_ref, c3_ref, x_ref, wd_ref, wn_ref,
                dw_ref, b_ref, nc_ref, o_ref):
    """One grid step == one batch tile of BT rows.

    wd_ref / wn_ref hold the batch-independent factor matrices (3, IN, OUT):
      wd[0] = (mask_diag * exp(W)).T     contracted with x * exp(c1)
      wd[1] = (mu2 * W).T                contracted with x
      wd[2] = mu2.T                      contracted with x * c1
      wn[0] = (mask_diag * exp(2W)).T    contracted with exp(2*c1)
      wn[1] = (mu2^2 * W).T              contracted with 2*c1
      wn[2] = (mu2^2).T                  contracted with c1^2
    with mu2 = (1 - mask_diag) * mask_upper.  Valid because mask_diag is
    binary (mask_diag*mu2 == 0, mask_diag^2 == mask_diag).
    """
    c1 = c1_ref[...].astype(jnp.float32)      # (BT, IN)
    x = x_ref[...].astype(jnp.float32)        # (BT, IN)
    e1 = jnp.exp(c1)                          # exp(c1)

    def mm(lhs, rhs):
        return jnp.dot(lhs, rhs, preferred_element_type=jnp.float32)

    # dot[b, o]  = sum_i x[b, i] * wm[b, o, i]
    dot_row = mm(x * e1, wd_ref[0]) + mm(x, wd_ref[1]) + mm(x * c1, wd_ref[2])
    # norm[b, o] = sum_i wm[b, o, i]^2   (nc_ref holds the constant
    #              sum_i mu2^2 * W^2 term, precomputed in the wrapper)
    norm_row = (mm(e1 * e1, wn_ref[0]) + mm(2.0 * c1, wn_ref[1])
                + mm(c1 * c1, wn_ref[2]) + nc_ref[...])

    c2 = c2_ref[...].astype(jnp.float32)      # (BT, OUT)
    c3 = c3_ref[...].astype(jnp.float32)      # (BT, OUT)
    # out = exp(c2 + diag_w) / sqrt(norm) * dot + bias + c3
    scale = jnp.exp(c2 + dw_ref[...]) * lax.rsqrt(norm_row)
    o_ref[...] = (scale * dot_row + b_ref[...] + c3).astype(o_ref.dtype)

    # TODO(synk): tmp_wpl (create_wpl) is a stored side-attribute used only by
    # log_diag_jacobian, not by forward's returned value; omitted here.


def masked_conditional_weight_forward(condition, inputs, weight, mask_diag,
                                      mask_upper, diag_w, bias, *, block_b=128):
    B, in_f = inputs.shape
    out_f = weight.shape[0]
    out_dtype = inputs.dtype

    # ---- plain-JAX glue: slice the conditioning vector ----
    c1 = condition[:, :in_f]
    c2 = condition[:, in_f:in_f + out_f]
    c3 = condition[:, in_f + out_f:in_f + 2 * out_f]

    # ---- parameter-only precompute (independent of the batch) ----
    w32 = weight.astype(jnp.float32)
    md = mask_diag.astype(jnp.float32)
    mu2 = (1.0 - md) * mask_upper.astype(jnp.float32)   # combined off-diag mask
    # dot factors (each (IN, OUT))
    a1 = (md * jnp.exp(w32)).T
    a2 = (mu2 * w32).T
    a3 = mu2.T
    # norm factors (each (IN, OUT))
    b1 = (md * jnp.exp(2.0 * w32)).T
    b3 = (mu2 * mu2 * w32).T
    b4 = (mu2 * mu2).T
    w_dot = jnp.stack([a1, a2, a3], axis=0)              # (3, IN, OUT)
    w_norm = jnp.stack([b1, b3, b4], axis=0)             # (3, IN, OUT)
    norm_const = (mu2 * mu2 * w32 * w32).sum(axis=-1).reshape(1, out_f)
    dw_row = diag_w.astype(jnp.float32).reshape(1, out_f)
    b_row = jnp.asarray(bias, jnp.float32).reshape(1, out_f)

    # ---- batch tiling (BT multiple of 8; pad B up to a multiple of BT) ----
    bt = min(block_b, ((B + 7) // 8) * 8)
    bt = max(8, (bt // 8) * 8)
    b_pad = ((B + bt - 1) // bt) * bt
    if b_pad != B:
        pad = b_pad - B
        c1 = jnp.pad(c1, ((0, pad), (0, 0)))
        c2 = jnp.pad(c2, ((0, pad), (0, 0)))
        c3 = jnp.pad(c3, ((0, pad), (0, 0)))
        x = jnp.pad(inputs, ((0, pad), (0, 0)))
    else:
        x = inputs

    per_tile_in = lambda i: (i, 0)
    shared2 = lambda i: (0, 0)
    shared3 = lambda i: (0, 0, 0)

    out = pl.pallas_call(
        _mcw_kernel,
        out_shape=jax.ShapeDtypeStruct((b_pad, out_f), out_dtype),
        grid_spec=pltpu.PrefetchScalarGridSpec(
            num_scalar_prefetch=0,
            grid=(b_pad // bt,),
            in_specs=[
                pl.BlockSpec((bt, in_f), per_tile_in),     # c1
                pl.BlockSpec((bt, out_f), per_tile_in),    # c2
                pl.BlockSpec((bt, out_f), per_tile_in),    # c3
                pl.BlockSpec((bt, in_f), per_tile_in),     # inputs
                pl.BlockSpec((3, in_f, out_f), shared3),   # dot factor matrices
                pl.BlockSpec((3, in_f, out_f), shared3),   # norm factor matrices
                pl.BlockSpec((1, out_f), shared2),         # diag_w row
                pl.BlockSpec((1, out_f), shared2),         # bias row
                pl.BlockSpec((1, out_f), shared2),         # constant norm term
            ],
            out_specs=pl.BlockSpec((bt, out_f), per_tile_in),
        ),
        compiler_params=pltpu.CompilerParams(
            dimension_semantics=("parallel",),
            vmem_limit_bytes=64 * 1024 * 1024),
    )(c1, c2, c3, x, w_dot, w_norm, dw_row, b_row, norm_const)

    return out[:B]


def init_params(key, in_features, out_features, dim, fill_upper=0.0):
    """Deterministic re-implementation of MaskedWeight.__init__ parameter shapes."""
    kd = out_features // dim
    kin = in_features // dim
    k1, k2 = jax.random.split(key)

    # weight: block-lower-triangular normal init * 0.1
    w_full = jax.random.normal(k1, (out_features, in_features), jnp.float32)
    lower = np.zeros((out_features, in_features), np.float32)
    for i in range(dim):
        lower[i * kd:(i + 1) * kd, :(i + 1) * kin] = 1.0
    weight = w_full * jnp.asarray(lower) * 0.1

    bias = jnp.zeros((out_features,), jnp.float32)

    mask_diag = np.zeros((out_features, in_features), np.float32)
    for i in range(dim):
        mask_diag[i * kd:(i + 1) * kd, i * kin:(i + 1) * kin] = 1.0

    mask_upper = np.ones((out_features, in_features), np.float32)
    for i in range(dim - 1):
        mask_upper[i * kd:(i + 1) * kd, (i + 1) * kin:] = fill_upper

    # diag_w = log(rand(out_features, 1))
    diag_w = jnp.log(jax.random.uniform(k2, (out_features, 1), jnp.float32,
                                        minval=1e-3, maxval=1.0))

    return (weight, jnp.asarray(mask_diag), jnp.asarray(mask_upper),
            diag_w, bias)


def reference_forward(condition, inputs, weight, mask_diag, mask_upper,
                      diag_w, bias):
    """Pure-JAX transcription of the PyTorch forward, for verification."""
    in_f = inputs.shape[1]
    out_f = weight.shape[0]
    c1 = condition[:, :in_f][:, None, :]                       # (B, 1, IN)
    c2 = condition[:, in_f:in_f + out_f][:, :, None]           # (B, OUT, 1)
    c3 = condition[:, in_f + out_f:in_f + 2 * out_f]           # (B, OUT)
    w = c1 + weight[None]                                      # (B, OUT, IN)
    w = mask_diag * jnp.exp(w) + (1.0 - mask_diag) * w * mask_upper
    norm = (w ** 2).sum(-1, keepdims=True)
    w = jnp.exp(c2 + diag_w[None]) * w / jnp.sqrt(norm)
    # elementwise-exact contraction (avoids any low-precision matmul path)
    out = (inputs[:, None, :] * w).sum(-1) + bias + c3
    return out


if __name__ == "__main__":
    B = 20
    in_features = 16
    out_features = 32
    dim = 4

    key = jax.random.PRNGKey(0)
    kp, kc, kx = jax.random.split(key, 3)

    weight, mask_diag, mask_upper, diag_w, bias = init_params(
        kp, in_features, out_features, dim)

    condition = jax.random.normal(
        kc, (B, in_features + 2 * out_features), jnp.float32)
    inputs = jax.random.normal(kx, (B, in_features), jnp.float32)

    # block_b=8 at this tiny batch -> grid of 3 tiles (exercises padding and
    # constant-block reuse across grid steps); real workloads use the default.
    out = masked_conditional_weight_forward(
        condition, inputs, weight, mask_diag, mask_upper, diag_w, bias,
        block_b=8)
    out = jax.block_until_ready(out)

    ref = reference_forward(condition, inputs, weight, mask_diag, mask_upper,
                            diag_w, bias)
    ref = jax.block_until_ready(ref)

    np.testing.assert_allclose(np.asarray(out), np.asarray(ref),
                               rtol=1e-4, atol=1e-4)
    print("KERNEL_OK")
</pallas_src>

<mosaic_0001>
module attributes {stable_mosaic.version = 11 : i64} {
  func.func @_mcw_kernel(%arg0: i32, %arg1: memref<8x16xf32, #tpu.memory_space<vmem>>, %arg2: memref<8x32xf32, #tpu.memory_space<vmem>>, %arg3: memref<8x32xf32, #tpu.memory_space<vmem>>, %arg4: memref<8x16xf32, #tpu.memory_space<vmem>>, %arg5: memref<3x16x32xf32, #tpu.memory_space<vmem>>, %arg6: memref<3x16x32xf32, #tpu.memory_space<vmem>>, %arg7: memref<1x32xf32, #tpu.memory_space<vmem>>, %arg8: memref<1x32xf32, #tpu.memory_space<vmem>>, %arg9: memref<1x32xf32, #tpu.memory_space<vmem>>, %arg10: memref<8x32xf32, #tpu.memory_space<vmem>>) attributes {dimension_semantics = [#tpu.dimension_semantics<parallel>], iteration_bounds = array<i64: 3>, scalar_prefetch = 0 : i64, scratch_operands = 0 : i64, tpu.core_type = #tpu.core_type<tc>, window_params = [{transform_indices = @transform_0, window_bounds = array<i64: 8, 16>}, {transform_indices = @transform_1, window_bounds = array<i64: 8, 32>}, {transform_indices = @transform_2, window_bounds = array<i64: 8, 32>}, {transform_indices = @transform_3, window_bounds = array<i64: 8, 16>}, {pipeline_mode = #tpu.pipeline_mode<synchronous>, transform_indices = @transform_4, window_bounds = array<i64: 3, 16, 32>}, {pipeline_mode = #tpu.pipeline_mode<synchronous>, transform_indices = @transform_5, window_bounds = array<i64: 3, 16, 32>}, {pipeline_mode = #tpu.pipeline_mode<synchronous>, transform_indices = @transform_6, window_bounds = array<i64: 1, 32>}, {pipeline_mode = #tpu.pipeline_mode<synchronous>, transform_indices = @transform_7, window_bounds = array<i64: 1, 32>}, {pipeline_mode = #tpu.pipeline_mode<synchronous>, transform_indices = @transform_8, window_bounds = array<i64: 1, 32>}, {transform_indices = @transform_9, window_bounds = array<i64: 8, 32>}]} {
    %c0 = arith.constant 0 : index
    %c0_0 = arith.constant 0 : index
    %0 = vector.load %arg1[%c0, %c0_0] : memref<8x16xf32, #tpu.memory_space<vmem>>, vector<8x16xf32>
    %c0_1 = arith.constant 0 : index
    %c0_2 = arith.constant 0 : index
    %1 = vector.load %arg4[%c0_1, %c0_2] : memref<8x16xf32, #tpu.memory_space<vmem>>, vector<8x16xf32>
    %2 = math.exp %0 : vector<8x16xf32>
    %3 = arith.mulf %1, %2 : vector<8x16xf32>
    %c0_3 = arith.constant 0 : index
    %c0_4 = arith.constant 0 : index
    %c0_5 = arith.constant 0 : index
    %4 = vector.load %arg5[%c0_3, %c0_4, %c0_5] : memref<3x16x32xf32, #tpu.memory_space<vmem>>, vector<1x16x32xf32>
    %5 = vector.shape_cast %4 : vector<1x16x32xf32> to vector<16x32xf32>
    %cst = arith.constant dense<0.000000e+00> : vector<8x32xf32>
    %6 = tpu.matmul %3, %5, %cst {dimension_numbers = #tpu.dot_dimension_numbers<[1], [0], [0], [1], [0, 0, 1, 1], [], []>} : vector<8x16xf32>, vector<16x32xf32>, vector<8x32xf32> -> vector<8x32xf32>
    %c1 = arith.constant 1 : index
    %c0_6 = arith.constant 0 : index
    %c0_7 = arith.constant 0 : index
    %7 = vector.load %arg5[%c1, %c0_6, %c0_7] : memref<3x16x32xf32, #tpu.memory_space<vmem>>, vector<1x16x32xf32>
    %8 = vector.shape_cast %7 : vector<1x16x32xf32> to vector<16x32xf32>
    %cst_8 = arith.constant dense<0.000000e+00> : vector<8x32xf32>
    %9 = tpu.matmul %1, %8, %cst_8 {dimension_numbers = #tpu.dot_dimension_numbers<[1], [0], [0], [1], [0, 0, 1, 1], [], []>} : vector<8x16xf32>, vector<16x32xf32>, vector<8x32xf32> -> vector<8x32xf32>
    %10 = arith.addf %6, %9 : vector<8x32xf32>
    %11 = arith.mulf %1, %0 : vector<8x16xf32>
    %c2 = arith.constant 2 : index
    %c0_9 = arith.constant 0 : index
    %c0_10 = arith.constant 0 : index
    %12 = vector.load %arg5[%c2, %c0_9, %c0_10] : memref<3x16x32xf32, #tpu.memory_space<vmem>>, vector<1x16x32xf32>
    %13 = vector.shape_cast %12 : vector<1x16x32xf32> to vector<16x32xf32>
    %cst_11 = arith.constant dense<0.000000e+00> : vector<8x32xf32>
    %14 = tpu.matmul %11, %13, %cst_11 {dimension_numbers = #tpu.dot_dimension_numbers<[1], [0], [0], [1], [0, 0, 1, 1], [], []>} : vector<8x16xf32>, vector<16x32xf32>, vector<8x32xf32> -> vector<8x32xf32>
    %15 = arith.addf %10, %14 : vector<8x32xf32>
    %16 = arith.mulf %2, %2 : vector<8x16xf32>
    %c0_12 = arith.constant 0 : index
    %c0_13 = arith.constant 0 : index
    %c0_14 = arith.constant 0 : index
    %17 = vector.load %arg6[%c0_12, %c0_13, %c0_14] : memref<3x16x32xf32, #tpu.memory_space<vmem>>, vector<1x16x32xf32>
    %18 = vector.shape_cast %17 : vector<1x16x32xf32> to vector<16x32xf32>
    %cst_15 = arith.constant dense<0.000000e+00> : vector<8x32xf32>
    %19 = tpu.matmul %16, %18, %cst_15 {dimension_numbers = #tpu.dot_dimension_numbers<[1], [0], [0], [1], [0, 0, 1, 1], [], []>} : vector<8x16xf32>, vector<16x32xf32>, vector<8x32xf32> -> vector<8x32xf32>
    %cst_16 = arith.constant 2.000000e+00 : f32
    %20 = vector.broadcast %cst_16 : f32 to vector<8x16xf32>
    %21 = arith.mulf %20, %0 : vector<8x16xf32>
    %c1_17 = arith.constant 1 : index
    %c0_18 = arith.constant 0 : index
    %c0_19 = arith.constant 0 : index
    %22 = vector.load %arg6[%c1_17, %c0_18, %c0_19] : memref<3x16x32xf32, #tpu.memory_space<vmem>>, vector<1x16x32xf32>
    %23 = vector.shape_cast %22 : vector<1x16x32xf32> to vector<16x32xf32>
    %cst_20 = arith.constant dense<0.000000e+00> : vector<8x32xf32>
    %24 = tpu.matmul %21, %23, %cst_20 {dimension_numbers = #tpu.dot_dimension_numbers<[1], [0], [0], [1], [0, 0, 1, 1], [], []>} : vector<8x16xf32>, vector<16x32xf32>, vector<8x32xf32> -> vector<8x32xf32>
    %25 = arith.addf %19, %24 : vector<8x32xf32>
    %26 = arith.mulf %0, %0 : vector<8x16xf32>
    %c2_21 = arith.constant 2 : index
    %c0_22 = arith.constant 0 : index
    %c0_23 = arith.constant 0 : index
    %27 = vector.load %arg6[%c2_21, %c0_22, %c0_23] : memref<3x16x32xf32, #tpu.memory_space<vmem>>, vector<1x16x32xf32>
    %28 = vector.shape_cast %27 : vector<1x16x32xf32> to vector<16x32xf32>
    %cst_24 = arith.constant dense<0.000000e+00> : vector<8x32xf32>
    %29 = tpu.matmul %26, %28, %cst_24 {dimension_numbers = #tpu.dot_dimension_numbers<[1], [0], [0], [1], [0, 0, 1, 1], [], []>} : vector<8x16xf32>, vector<16x32xf32>, vector<8x32xf32> -> vector<8x32xf32>
    %30 = arith.addf %25, %29 : vector<8x32xf32>
    %c0_25 = arith.constant 0 : index
    %c0_26 = arith.constant 0 : index
    %31 = vector.load %arg9[%c0_25, %c0_26] : memref<1x32xf32, #tpu.memory_space<vmem>>, vector<1x32xf32>
    %32 = vector.broadcast %31 : vector<1x32xf32> to vector<8x32xf32>
    %33 = arith.addf %30, %32 : vector<8x32xf32>
    %c0_27 = arith.constant 0 : index
    %c0_28 = arith.constant 0 : index
    %34 = vector.load %arg2[%c0_27, %c0_28] : memref<8x32xf32, #tpu.memory_space<vmem>>, vector<8x32xf32>
    %c0_29 = arith.constant 0 : index
    %c0_30 = arith.constant 0 : index
    %35 = vector.load %arg3[%c0_29, %c0_30] : memref<8x32xf32, #tpu.memory_space<vmem>>, vector<8x32xf32>
    %c0_31 = arith.constant 0 : index
    %c0_32 = arith.constant 0 : index
    %36 = vector.load %arg7[%c0_31, %c0_32] : memref<1x32xf32, #tpu.memory_space<vmem>>, vector<1x32xf32>
    %37 = vector.broadcast %36 : vector<1x32xf32> to vector<8x32xf32>
    %38 = arith.addf %34, %37 : vector<8x32xf32>
    %39 = math.exp %38 : vector<8x32xf32>
    %40 = math.rsqrt %33 : vector<8x32xf32>
    %41 = arith.mulf %39, %40 : vector<8x32xf32>
    %42 = arith.mulf %41, %15 : vector<8x32xf32>
    %c0_33 = arith.constant 0 : index
    %c0_34 = arith.constant 0 : index
    %43 = vector.load %arg8[%c0_33, %c0_34] : memref<1x32xf32, #tpu.memory_space<vmem>>, vector<1x32xf32>
    %44 = vector.broadcast %43 : vector<1x32xf32> to vector<8x32xf32>
    %45 = arith.addf %42, %44 : vector<8x32xf32>
    %46 = arith.addf %45, %35 : vector<8x32xf32>
    %c0_35 = arith.constant 0 : index
    %c0_36 = arith.constant 0 : index
    %47 = vector.load %arg10[%c0_35, %c0_36] : memref<8x32xf32, #tpu.memory_space<vmem>>, vector<8x32xf32>
    tpu.vector_store %arg10[%c0_35, %c0_36], %46 {strides = array<i32>} : memref<8x32xf32, #tpu.memory_space<vmem>>, vector<8x32xf32>,
    return
  }
  func.func @transform_0(%arg0: i32) -> (i32, i32) {
    %c0_i32 = arith.constant 0 : i32
    %c0_i32_0 = arith.constant 0 : i32
    return %arg0, %c0_i32 : i32, i32
  }
  func.func @transform_1(%arg0: i32) -> (i32, i32) {
    %c0_i32 = arith.constant 0 : i32
    %c0_i32_0 = arith.constant 0 : i32
    return %arg0, %c0_i32 : i32, i32
  }
  func.func @transform_2(%arg0: i32) -> (i32, i32) {
    %c0_i32 = arith.constant 0 : i32
    %c0_i32_0 = arith.constant 0 : i32
    return %arg0, %c0_i32 : i32, i32
  }
  func.func @transform_3(%arg0: i32) -> (i32, i32) {
    %c0_i32 = arith.constant 0 : i32
    %c0_i32_0 = arith.constant 0 : i32
    return %arg0, %c0_i32 : i32, i32
  }
  func.func @transform_4(%arg0: i32) -> (i32, i32, i32) {
    %c0_i32 = arith.constant 0 : i32
    %c0_i32_0 = arith.constant 0 : i32
    %c0_i32_1 = arith.constant 0 : i32
    %c0_i32_2 = arith.constant 0 : i32
    return %c0_i32, %c0_i32_0, %c0_i32_1 : i32, i32, i32
  }
  func.func @transform_5(%arg0: i32) -> (i32, i32, i32) {
    %c0_i32 = arith.constant 0 : i32
    %c0_i32_0 = arith.constant 0 : i32
    %c0_i32_1 = arith.constant 0 : i32
    %c0_i32_2 = arith.constant 0 : i32
    return %c0_i32, %c0_i32_0, %c0_i32_1 : i32, i32, i32
  }
  func.func @transform_6(%arg0: i32) -> (i32, i32) {
    %c0_i32 = arith.constant 0 : i32
    %c0_i32_0 = arith.constant 0 : i32
    %c0_i32_1 = arith.constant 0 : i32
    return %c0_i32, %c0_i32_0 : i32, i32
  }
  func.func @transform_7(%arg0: i32) -> (i32, i32) {
    %c0_i32 = arith.constant 0 : i32
    %c0_i32_0 = arith.constant 0 : i32
    %c0_i32_1 = arith.constant 0 : i32
    return %c0_i32, %c0_i32_0 : i32, i32
  }
  func.func @transform_8(%arg0: i32) -> (i32, i32) {
    %c0_i32 = arith.constant 0 : i32
    %c0_i32_0 = arith.constant 0 : i32
    %c0_i32_1 = arith.constant 0 : i32
    return %c0_i32, %c0_i32_0 : i32, i32
  }
  func.func @transform_9(%arg0: i32) -> (i32, i32) {
    %c0_i32 = arith.constant 0 : i32
    %c0_i32_0 = arith.constant 0 : i32
    return %arg0, %c0_i32 : i32, i32
  }
}

</mosaic_0001>

<bundles_post_ra>
// kernel: tpu_custom_call.1
= control target key start
LH: loop header
LB: loop body
LE: loop exit
PB: predicated region body
PF: predicated region fallthrough
CT: control target
= control target key end

     0   :  { %s1315_s0 = inlined_call_operand.vmem [shape: f32[24,16], index: 0, kind: input, shape index: {}]   ;;  %s1316_s1 = inlined_call_operand.hbm [shape: f32[24,32], index: 1, kind: input, shape index: {}]   ;;  %s1317_s2 = inlined_call_operand.hbm [shape: f32[24,32], index: 2, kind: input, shape index: {}]   ;;  %s1318_s3 = inlined_call_operand.vmem [shape: f32[24,16], index: 3, kind: input, shape index: {}]   ;;  %s1319_s4 = inlined_call_operand.vmem [shape: f32[3,16,32], index: 4, kind: input, shape index: {}]   ;;  %s1320_s5 = inlined_call_operand.hbm [shape: f32[3,16,32], index: 5, kind: input, shape index: {}]   ;;  %s1321_s6 = inlined_call_operand.vmem [shape: f32[1,32], index: 6, kind: input, shape index: {}]   ;;  %s1322_s7 = inlined_call_operand.vmem [shape: f32[1,32], index: 7, kind: input, shape index: {}]   ;;  %s1323_s8 = inlined_call_operand.vmem [shape: f32[1,32], index: 8, kind: input, shape index: {}]   ;;  %s1324_s9 = inlined_call_operand.hbm [shape: f32[24,32], index: 9, kind: output, shape index: {}]  }
   0x1   :  { %1333 = sst [smem:[#allocation20_spill]] %s1320_s5 }
   0x2   :  { %14 = vsyncpa [#allocation3], 0 }
   0x3   :  { %16 = vsyncpa [#allocation3 + $0x1], 0 }
   0x4   :  { %17 = vsyncpa [#allocation6], 0 }
   0x5   :  { %19 = vsyncpa [#allocation6 + $0x1], 0 }
   0x6   :  { %20 = vsyncpa [#allocation4], 0 }
   0x7   :  { %22 = vsyncpa [#allocation4 + $0x1], 0  ;;  %s1102_s30 = smov 0   ;;  %s1104_s10 = smov 0  }
   0x8   :  { %s1106_s11 = smov 0   ;;  %s1108_s12 = smov 0  }
   0x9 LB: > { %1334 = sst [smem:[#allocation13_spill]] %s1035_s30  ;;  %s1126_s16 = sadd.s32 4294967295, %s1047_s12   ;;  %s1047_s12 = sphi %s1108_s12, %s1352_s12   ;;  %s1043_s11 = sphi %s1106_s11, %s1354_s11   ;;  %s1039_s10 = sphi %s1104_s10, %s1356_s10   ;;  %s1035_s30 = sphi %s1102_s30, %s1355_s30  }
   0xa   : > { %1335 = sst [smem:[#allocation14_spill]] %s1043_s11  ;;  %p782_p0 = scmp.ge.s32.totalorder %s1047_s12, 1 }
   0xb   : > { %1336 = sst [smem:[#allocation15_spill]] %s1047_s12  ;;  %p75_p1 = scmp.eq.s32.totalorder %s1126_s16, 0 }
   0xc   : > { %s1337_s5 = sld [smem:[#allocation20_spill]]  ;;  %p268_p2 = scmp.lt.s32.totalorder %s1047_s12, 4 }
   0xd   : > { %s1049_s18 = smov [#allocation7]   ;;  %s1050_s20 = smov 128  }
   0xe   : > { %p1131_p3 = pnand %p782_p0, %p268_p2  ;;  %s284_s19 = sshll.u32 %s1049_s18, 4  ;;  %s285_s19 = int_to_ptr.vmem [resolvable:$true] %s284_s19 }
   0xf   : > { %s1051_s21 = smov 8   ;;  %s781_s22 = sadd.s32 4294967294, %s1047_s12  }
  0x10   : > { %p820_p4 = pneg %p1131_p3  ;;  %s1141_s23 = sadd.s32 1, %s1047_s12  }
  0x11   : > { %1339 = sst [smem:[#allocation16_spill]] %s1141_s23  ;;  %s61_s24 = sadd.s32 1, %s1043_s11 }
  0x12   : > { %s282_s15 = sshll.u32 %s1337_s5, 4  ;;  %p821_p5 = pnand %p820_p4, %p75_p1  ;;  %s283_s15 = int_to_ptr.hbm [resolvable:$true] %s282_s15 }
  0x13   : > { %s58_s25 = ssub.s32 %s1047_s12, %s1141_s23  ;;  %p68_p6 = scmp.ne.s32.totalorder %s1043_s11, %s1039_s10 }
  0x14   : > { %823 = dma.hbm_to_vmem [thread:$0]  (!%p821_p5), %s283_s15, 768, %s285_s19, [#allocation6], %s1050_s20, %s1050_s20, %s1051_s21  }
  0x15   : > { %p59_p7 = scmp.eq.s32.totalorder %s58_s25, 0  ;;  %p69_p8 = scmp.eq.s32.totalorder %s1047_s12, 0 }
  0x16   : > { %p74_p9 = scmp.ne.s32.totalorder %s1039_s10, %s1035_s30  ;;  %p255_p10 = scmp.eq.s32.totalorder %s1126_s16, 2 }
  0x17   : > { %s1153_s26 = scalar_select %p59_p7, %s1043_s11, %s61_s24  }
  0x18   : > { %p1155_p11 = por %p69_p8, %p68_p6  ;;  %p1161_p12 = por %p75_p1, %p74_p9 }
  0x19   : > { %1340 = sst [smem:[#allocation17_spill]] %s1153_s26  ;;  %p1165_p13 = por %p255_p10, %p68_p6 }
  0x1a   : > { %p261_p0 = scmp.eq.s32.totalorder %s781_s22, 2  ;;  %p836_p2 = scmp.lt.s32.totalorder %s1047_s12, 3 }
  0x1b   : > { %s1343_s29 = scalar_select %p1165_p13, 1, 0 }
  0x1c   : > { %s314_s13 = sand.u32 1, %s1043_s11   ;;  %p1171_p4 = por %p261_p0, %p74_p9 }
  0x1d   : > { %1344 = sst [smem:[#allocation18_spill]] %s1343_s29  ;;  %s785_s15 = sshll.u32 %s314_s13, 3 }
  0x1e   : > { %s1345_s14 = scalar_select %p1171_p4, 1, 0 }
  0x1f   : > { %s786_s18 = sshll.u32 %s1047_s12, 3  ;;  %s318_s25 = scalar_lea.vmem [#allocation2], %s785_s15 }
  0x20   : > { %1346 = sst [smem:[#allocation19_spill]] %s1345_s14  ;;  %s322_s21 = scalar_lea.hbm %s1316_s1, %s786_s18 }
  0x21   : > { %s324_s24 = sshll.u32 %s322_s21, 4  ;;  %s326_s5 = sshll.u32 %s318_s25, 4  ;;  %s325_s24 = int_to_ptr.hbm [resolvable:$true] %s324_s24  ;;  %s327_s5 = int_to_ptr.vmem [resolvable:$true] %s326_s5 }
  0x22   : > { %p1181_p5 = pnand %p836_p2, %p1155_p11  ;;  %s341_s23 = scalar_lea.hbm %s1317_s2, %s786_s18 }
  0x23   : > { %s333_s14 = sand.u32 1, %s1047_s12   ;;  %s315_s30 = scalar_lea.sflag [#allocation3], %s314_s13 }
  0x24   : > { %s913_s19 = sshra.s32 %s325_s24, 4  ;;  %p917_p7 = pneg %p1181_p5  ;;  %s914_s19 = int_to_ptr.hbm [resolvable:$true] %s913_s19 }
  0x25   : > { %s915_s20 = scalar_lea.hbm %s914_s19, 8  ;;  %s920_s25 = scalar_lea.hbm %s1316_s1, 24 }
  0x26   : > { %p916_p6 = scmp.ne.s32.totalorder %s914_s19, %s915_s20  ;;  %p921_p10 = scmp.lt.s32.totalorder %s914_s19, %s1316_s1 }
  0x27   : > { %p922_p11 = scmp.lt.s32.totalorder %s920_s25, %s915_s20 }
  0x28   : > { %p918_p8 = pnand %p917_p7, %p916_p6 }
  0x29   : > { %p923_p0 = por %p922_p11, %p921_p10 }
  0x2a   : > { %p919_p9 = pneg %p918_p8 }
  0x2c   : > { %p924_p2 = pnand %p923_p0, %p919_p9 }
  0x2e   : > { %927 = shalt.err (!%p924_p2)
}
  0x2f   : > { %827 = dma.hbm_to_vmem [thread:$0]  (!%p1181_p5), %s325_s24, 128, %s327_s5, %s315_s30  }
  0x30   : > { %s343_s13 = sshll.u32 %s341_s23, 4  ;;  %s337_s18 = scalar_lea.vmem [#allocation5], %s785_s15  ;;  %s344_s13 = int_to_ptr.hbm [resolvable:$true] %s343_s13 }
  0x31   : > { %s345_s12 = sshll.u32 %s337_s18, 4  ;;  %s334_s29 = scalar_lea.sflag [#allocation6], %s333_s14  ;;  %s346_s12 = int_to_ptr.vmem [resolvable:$true] %s345_s12 }
  0x32   : > { %s943_s27 = sshra.s32 %s344_s13, 4  ;;  %s950_s25 = scalar_lea.hbm %s1317_s2, 24  ;;  %s944_s27 = int_to_ptr.hbm [resolvable:$true] %s943_s27 }
  0x33   : > { %s945_s21 = scalar_lea.hbm %s944_s27, 8  ;;  %p951_p9 = scmp.lt.s32.totalorder %s944_s27, %s1317_s2 }
  0x34   : > { %p946_p6 = scmp.ne.s32.totalorder %s944_s27, %s945_s21  ;;  %p952_p11 = scmp.lt.s32.totalorder %s950_s25, %s945_s21 }
  0x36   : > { %p948_p8 = pnand %p946_p6, %p917_p7  ;;  %p953_p0 = por %p952_p11, %p951_p9 }
  0x38   : > { %p949_p10 = pneg %p948_p8 }
  0x3a   : > { %p954_p2 = pnand %p953_p0, %p949_p10 }
  0x3c   : > { %957 = shalt.err (!%p954_p2)
}
  0x3d   : > { %830 = dma.hbm_to_vmem [thread:$0]  (!%p1181_p5), %s344_s13, 128, %s346_s12, %s334_s29  }
  0x3e   : > { %361 = sbr.rel (%p1131_p3) target bundleno = 258 (0x102), region = 56  ;;  %s1216_s30 = sand.u32 (!%p1131_p3), 1, %s1039_s10  }
  0x3f   : > { %s1219_s23 = sshll.u32 (!%p1131_p3), %s1216_s30, 3  ;;  %s364_s14 = scalar_lea.sflag (!%p1131_p3), [#allocation3], %s1216_s30 }
  0x40   : > { %s367_s15 = scalar_lea.vmem (!%p1131_p3), [#allocation2], %s1219_s23 }
  0x43   : > { %1018 = dma.done.wait (%p1161_p12), %s364_s14, 128  }
  0x44   : > { %1020 = vsyncadd (%p1161_p12), %s364_s14, 4294967168  ;;  %s373_s12 = sand.u32 1, %s1126_s16   ;;  %s377_s29 = scalar_lea.vmem [#allocation5], %s1219_s23 }
  0x45   : > { %s374_s17 = scalar_lea.sflag [#allocation6], %s373_s12 }
  0x46   : > { %1022 = dma.done.wait (%p1161_p12), %s374_s17, 128  }
  0x47   : > { %1024 = vsyncadd (%p1161_p12), %s374_s17, 4294967168 }
  0x48   : > { %1026 = dma.done.wait (%p75_p1), [#allocation6], 768  }
  0x49   : > { %1028 = vsyncadd (%p75_p1), [#allocation6], 4294966528  ;;  %p431_p3 = scmp.lt.s32.totalorder %s1126_s16, 2  ;;  %v801_v0 = vld [vmem:[%s1319_s4 + $0x28] sm:$0xff]  ;;  %v797_v1 = vld [vmem:[%s1319_s4 + $0x18] sm:$0xff]  ;;  %vm449_vm0 = vcmask 130048  }
  0x4a   : > { %v800_v2 = vld [vmem:[%s1319_s4 + $0x20] sm:$0xff]  ;;  %517 = vmatpush.msra.mxu2 %v801_v0  ;;  %467 = vmatpush.msra.mxu0 %v797_v1  ;;  %v796_v5 = vld [vmem:[%s1319_s4 + $0x10] sm:$0xff]  ;;  %v445_v7 = vld [vmem:[%s1319_s4 + $0x8] sm:$0xff]  ;;  %s807_s19 = sshll.u32 %s1126_s16, 3  ;;  %s430_s12 = scalar_lea.vmem [#allocation8], %s1219_s23  ;;  %vm637_vm4 = vcmask 261120  }
  0x4b   : > { %s432_s24 = scalar_select %p431_p3, %s1126_s16, 2  ;;  %v530_v8 = vld [vmem:[#allocation7 + $0x18] sm:$0xff]  ;;  %v526_v10 = vld [vmem:[#allocation7 + $0x8] sm:$0xff]  ;;  %v444_v11 = vld [vmem:[%s1319_s4] sm:$0xff]  ;;  %490 = vmatpush.msra.mxu1 %v445_v7 }
  0x4c   : > { %518 = vmatpush.msra.mxu2 %v800_v2  ;;  %468 = vmatpush.msra.mxu0 %v796_v5  ;;  %v529_v12 = vld [vmem:[#allocation7 + $0x10] sm:$0xff]  ;;  %v580_v14 = vld [vmem:[#allocation7 + $0x28] sm:$0xff]  ;;  %v525_v15 = vld [vmem:[#allocation7] sm:$0xff]  ;;  %s650_s5 = scalar_lea.hbm %s1324_s9, %s807_s19  ;;  %s652_s17 = sshll.u32 %s430_s12, 4  ;;  %s653_s17 = int_to_ptr.vmem [resolvable:$true] %s652_s17 }
  0x4d   : > { %s794_s22 = sshll.u32 %s432_s24, 3  ;;  %548 = vmatpush.msra.mxu3 %v530_v8  ;;  %491 = vmatpush.msra.mxu1 %v444_v11  ;;  %v579_v16 = vld [vmem:[#allocation7 + $0x20] sm:$0xff]  ;;  %v611_v48 = vld [vmem:[%s377_s29] sm:$0xff]  ;;  %s654_s16 = sshll.u32 %s650_s5, 4  ;;  %s655_s16 = int_to_ptr.hbm [resolvable:$true] %s654_s16 }
  0x4e   : > { %s434_s18 = scalar_lea.vmem %s1315_s0, %s794_s22  ;;  %s438_s28 = scalar_lea.vmem %s1318_s3, %s794_s22  ;;  %571 = vmatpush.msrb.mxu0 %v526_v10  ;;  %v874_v26 = vld [vmem:[%s1323_s8] ss:$0 sm:$0xff] }
  0x4f   : > { %v439_v3 = vld [vmem:[%s434_s18] sm:$0xff]  ;;  %549 = vmatpush.msra.mxu3 %v529_v12  ;;  %598 = vmatpush.msrb.mxu1 %v580_v14  ;;  %s640_s24 = scalar_lea.sflag [#allocation4], %s1216_s30  ;;  %s987_s22 = sshra.s32 %s655_s16, 4  ;;  %s988_s22 = int_to_ptr.hbm [resolvable:$true] %s987_s22 }
  0x50   : > { %v440_v4 = vld [vmem:[%s438_s28] sm:$0xff]  ;;  %v441_v9 = vmul.f32 1.442695, %v439_v3  ;;  %v527_v13 = vmul.f32 2.0, %v439_v3  ;;  %572 = vmatpush.msrb.mxu0 %v525_v15  ;;  %v577_v20 = vmul.f32 %v439_v3, %v439_v3  ;;  %s989_s26 = scalar_lea.hbm %s988_s22, 8  ;;  %s993_s23 = scalar_lea.hbm %s1324_s9, 24 }
  0x51   : > { %v496_v6 = vmul.f32 %v440_v4, %v439_v3  ;;  %798 = vmatmul.msk.f32.vlgmr.msra.gmra.mxu0 %vm449_vm0, %v440_v4  ;;  %599 = vmatpush.msrb.mxu1 %v579_v16  ;;  %v875_v29 = vld [vmem:[%s1321_s6] ss:$0 sm:$0xff]  ;;  %p990_p1 = scmp.ne.s32.totalorder %s988_s22, %s989_s26  ;;  %p994_p7 = scmp.lt.s32.totalorder %s988_s22, %s1324_s9 }
  0x52   : > { %877 = vpow2.f32 %v441_v9  ;;  %803 = vmatmul.msk.f32.vlgmr.msra.gmra.mxu3 %vm449_vm0, %v527_v13  ;;  %v610_v31 = vld [vmem:[%s367_s15] sm:$0xff]  ;;  %p995_p6 = scmp.lt.s32.totalorder %s993_s23, %s989_s26 }
  0x53   : > { %802 = vmatmul.msk.f32.vlgmr.msra.gmra.mxu2 %vm449_vm0, %v496_v6  ;;  %v616_v32 = vadd.f32 %v875_v29, %v610_v31  ;;  %v876_v46 = vld [vmem:[%s1322_s7] ss:$0 sm:$0xff]  ;;  %p991_p12 = pnand %p990_p1, %p1165_p13 }
  0x54   : > { %p996_p8 = por %p995_p6, %p994_p7 }
  0x55   : > { %v617_v33 = vmul.f32 1.442695, %v616_v32  ;;  %p992_p5 = pneg %p991_p12 }
  0x57   : > { %p997_p10 = pnand %p996_p8, %p992_p5 }
  0x58   : > { %v878_v17 = vpop.eup %877 }
  0x59   : > { %v443_v18 = vmul.f32 %v878_v17, %v440_v4  ;;  %v524_v19 = vmul.f32 %v878_v17, %v878_v17 }
  0x5b   : > { %799 = vmatmul.msk.f32.vlgmr.msra.gmra.mxu1 %vm449_vm0, %v443_v18  ;;  %804 = vmatmul.msk.f32.vlgmr.msrb.gmra.mxu0 %vm449_vm0, %v524_v19 }
  0x63   : > { %805 = vmatmul.msk.f32.vlgmr.msrb.gmra.mxu1 %vm449_vm0, %v577_v20 }
  0xce   : > { %v470_v21 = vpop.f32.mrf.mxu0 }
  0xd5   : > { %v551_v23 = vpop.f32.mrf.mxu3 }
  0xd6   : > { %v520_v41 = vpop.f32.mrf.mxu2 }
  0xd8   : > { %v493_v22 = vpop.f32.mrf.mxu1  ;;  %v574_v24 = vpop.f32.mrf.mxu0 }
  0xd9   : > { %v575_v25 = vadd.f32 %v574_v24, %v551_v23  ;;  %v494_v39 = vadd.f32 %v493_v22, %v470_v21 }
  0xdb   : > { %v523_v44 = vadd.f32 %v520_v41, %v494_v39 }
  0xe0   : > { %v601_v27 = vpop.f32.mrf.mxu1 }
  0xe1   : > { %v604_v28 = vadd.f32 %v601_v27, %v575_v25 }
  0xe3   : > { %v609_v30 = vadd.f32 %v874_v26, %v604_v28 }
  0xe5   : > { %879 = vrsqrt.f32 %v609_v30  ;;  %vm625_vm2 = vweird.f32 %v609_v30 }
  0xe6   : > { %881 = vpow2.f32 %v617_v33 }
  0xeb   : > { %v880_v34 = vpop.eup %879 }
  0xec   : > { %v620_v35 = vmul.f32 %v880_v34, %v609_v30  ;;  %vm626_vm1 = vweird.f32 %v880_v34  ;;  %v882_v40 = vpop.eup %881 }
  0xed   : > { %vm627_vm3 = vmor %vm625_vm2, %vm626_vm1 }
  0xee   : > { %v621_v36 = vmul.f32 %v880_v34, %v620_v35 }
  0xf0   : > { %v622_v37 = vmul.f32 0.5, %v621_v36 }
  0xf2   : > { %v623_v38 = vsub.f32 1.5, %v622_v37 }
  0xf4   : > { %v624_v42 = vmul.f32 %v880_v34, %v623_v38 }
  0xf6   : > { %v628_v43 = vsel %vm627_vm3, %v880_v34, %v624_v42 }
  0xf7   : > { %v629_v45 = vmul.f32 %v882_v40, %v628_v43 }
  0xf9   : > { %v630_v47 = vmul.f32 %v629_v45, %v523_v44 }
  0xfb   : > { %v635_v49 = vadd.f32 %v876_v46, %v630_v47 }
  0xfd   : > { %v636_v50 = vadd.f32 %v635_v49, %v611_v48 }
  0xff   : > { %638 = vst.msk [vmem:[%s430_s12] sm:$0xff] %vm637_vm4, %v636_v50 }
 0x100   : > { %1000 = shalt.err (!%p997_p10)
}
 0x101   : > { %818 = dma.vmem_to_hbm [thread:$0]  (%p1165_p13), %s653_s17, 128, %s655_s16, %s640_s24  }
 0x102 PF: > { %s1349_s30 = sld [smem:[#allocation15_spill]] }
 0x103   : > { %s1350_s21 = sld [smem:[#allocation13_spill]] }
 0x108   : > { %p838_p9 = scmp.ge.s32.totalorder %s1349_s30, 2 }
 0x109   : > { %s666_s19 = sand.u32 1, %s1350_s21  }
 0x10a   : > { %p832_p11 = pnand %p838_p9, %p1171_p4  ;;  %s667_s15 = scalar_lea.sflag [#allocation4], %s666_s19 }
 0x10c   : > { %p833_p0 = pneg %p832_p11 }
 0x10e   : > { %1030 = dma.done.wait (%p833_p0), %s667_s15, 128  }
 0x10f   : > { %1032 = vsyncadd (%p833_p0), %s667_s15, 4294967168  ;;  %s1352_s12 = sld [smem:[#allocation16_spill]]  ;;  %s1355_s30 = smov %s1039_s10 }
 0x110   : > { %s1353_s20 = sld [smem:[#allocation14_spill]] }
 0x111   : > { %s1354_s11 = sld [smem:[#allocation17_spill]] }
 0x115   : > { %p25_p2 = scmp.ge.s32.totalorder %s1352_s12, 5  }
 0x116   : > { %s1356_s10 = smov %s1353_s20 }
 0x117   :  { %27 = sbr.rel (!%p25_p2) target bundleno = 9 (0x9), region = 128 }
 0x11c   :  { %673 = vsyncpa [#allocation3], 1 }
 0x11d   :  { %675 = vsyncpa [#allocation3 + $0x1], 1 }
 0x11e   :  { %676 = vsyncpa [#allocation6], 1 }
 0x11f   :  { %678 = vsyncpa [#allocation6 + $0x1], 1 }
 0x120   :  { %679 = vsyncpa [#allocation4], 1 }
 0x121   :  { %681 = vsyncpa [#allocation4 + $0x1], 1 }

</bundles_post_ra>
